<compile_context>
chip_gen: v7x
topology: tpu7x:2x2x1
jax: 0.10.0
libtpu: 0.0.40
codegen_flags: <defaults>
</compile_context>

<pallas_src>
import functools
import math

import jax
import jax.numpy as jnp
from jax.experimental import pallas as pl
from jax.experimental.pallas import tpu as pltpu

HIDDEN1 = 128
HIDDEN2 = 64
LANE = 128


def _round_up(n, m):
    return ((n + m - 1) // m) * m


def _tensorcores_per_chip():
    """2 batch tiles on v7x (2 TCs/chip), 1 otherwise. Best-effort string check."""
    try:
        kind = jax.devices()[0].device_kind.lower()
    except Exception:
        return 1
    return 2 if "v7" in kind else 1


def _qnetwork_kernel(x_ref, w1_ref, b1_ref, w2_ref, b2_ref, w3_ref, b3_ref, o_ref):
    # fc1 + ReLU: x cast to bf16 in-kernel (VPU op hidden under the dot), f32 acc.
    x = x_ref[...].astype(jnp.bfloat16)
    h = jnp.dot(x, w1_ref[...], preferred_element_type=jnp.float32)
    h = jnp.maximum(h + b1_ref[...], 0.0)

    # fc2 + ReLU (HIDDEN2 zero-padded to 128 lanes -> full vregs; pads stay 0).
    h = jnp.dot(h.astype(jnp.bfloat16), w2_ref[...], preferred_element_type=jnp.float32)
    h = jnp.maximum(h + b2_ref[...], 0.0)

    # fc3 + ReLU (reference module ReLUs the output layer too).
    # Output padded to 128 lanes -> dense, unmasked stores.
    h = jnp.dot(h.astype(jnp.bfloat16), w3_ref[...], preferred_element_type=jnp.float32)
    o_ref[...] = jnp.maximum(h + b3_ref[...], 0.0)


def prepare_params(params):
    """One-time (per weight update) prep: bf16 weights, f32 biases, zero-pad
    HIDDEN2 and action_size up to 128 lanes. Zero padding preserves semantics:
    padded h2 lanes are ReLU(0 + 0) = 0 and contribute nothing to fc3."""
    h2 = params["w2"].shape[1]
    a = params["w3"].shape[1]
    h2_pad = _round_up(h2, LANE)
    a_pad = _round_up(a, LANE)

    w1 = params["w1"].astype(jnp.bfloat16)                                   # (S, 128)
    b1 = params["b1"].astype(jnp.float32).reshape(1, -1)                     # (1, 128)

    w2 = jnp.pad(params["w2"], ((0, 0), (0, h2_pad - h2))).astype(jnp.bfloat16)   # (128, 128)
    b2 = jnp.pad(params["b2"].astype(jnp.float32).reshape(1, -1),
                 ((0, 0), (0, h2_pad - h2)))                                      # (1, 128)

    w3 = jnp.pad(params["w3"], ((0, h2_pad - h2), (0, a_pad - a))).astype(jnp.bfloat16)  # (128, 128)
    b3 = jnp.pad(params["b3"].astype(jnp.float32).reshape(1, -1),
                 ((0, 0), (0, a_pad - a)))                                                # (1, 128)

    return {"w1": w1, "b1": b1, "w2": w2, "b2": b2, "w3": w3, "b3": b3}


@functools.partial(jax.jit, static_argnames=("action_size", "max_block_b", "num_batch_tiles"))
def qnetwork_forward(x, prepped, *, action_size, max_block_b=1024, num_batch_tiles=None):
    """x: [B, state_size] f32; prepped: output of prepare_params. Returns [B, action_size] f32."""
    B, S = x.shape
    a_pad = prepped["w3"].shape[1]

    if num_batch_tiles is None:
        num_batch_tiles = _tensorcores_per_chip()

    # One batch tile per TensorCore when the batch fits (grid=1 on v5e/v6e, 2 on v7x),
    # 8-row aligned (f32 sublane), capped to keep VMEM use trivially small.
    tb = min(max_block_b, _round_up(pl.cdiv(B, num_batch_tiles), 8))
    grid = (pl.cdiv(B, tb),)  # ragged last tile handled by Pallas masked writeback

    # Constant block index -> weights/biases stay VMEM-resident across batch tiles.
    resident = lambda arr: pl.BlockSpec(arr.shape, lambda i: (0, 0))

    out = pl.pallas_call(
        _qnetwork_kernel,
        out_shape=jax.ShapeDtypeStruct((B, a_pad), jnp.float32),
        grid=grid,
        in_specs=[
            pl.BlockSpec((tb, S), lambda i: (i, 0)),   # x: tiled along batch, f32
            resident(prepped["w1"]), resident(prepped["b1"]),
            resident(prepped["w2"]), resident(prepped["b2"]),
            resident(prepped["w3"]), resident(prepped["b3"]),
        ],
        out_specs=pl.BlockSpec((tb, a_pad), lambda i: (i, 0)),
        compiler_params=pltpu.CompilerParams(
            dimension_semantics=("parallel",),          # shards batch tiles across v7x's 2 TCs
        ),
    )(x, prepped["w1"], prepped["b1"], prepped["w2"], prepped["b2"],
      prepped["w3"], prepped["b3"])

    return out[:, :action_size]


def qnetwork_reference(x, params):
    """Pure-JAX reference with the same dtype flow as the kernel (bf16 MXU, f32 acc)."""
    h = x.astype(jnp.bfloat16)
    for wk, bk, last in (("w1", "b1", False), ("w2", "b2", False), ("w3", "b3", True)):
        h = jnp.dot(h, params[wk].astype(jnp.bfloat16),
                    preferred_element_type=jnp.float32)
        h = jnp.maximum(h + params[bk], 0.0)
        if not last:
            h = h.astype(jnp.bfloat16)
    return h


def qnetwork_reference_f32(x, params):
    """Full-f32 reference of the module semantics (loose sanity check)."""
    h = x
    for wk, bk in (("w1", "b1"), ("w2", "b2"), ("w3", "b3")):
        h = jnp.maximum(h @ params[wk] + params[bk], 0.0)
    return h


def init_params(key, state_size, action_size):
    """Deterministic init mimicking PyTorch nn.Linear default (U(-1/sqrt(fan_in), +))."""
    def linear(key, fan_in, fan_out):
        kw, kb = jax.random.split(key)
        bound = 1.0 / math.sqrt(fan_in)
        w = jax.random.uniform(kw, (fan_in, fan_out), jnp.float32, -bound, bound)
        b = jax.random.uniform(kb, (1, fan_out), jnp.float32, -bound, bound)
        return w, b

    k1, k2, k3 = jax.random.split(key, 3)
    w1, b1 = linear(k1, state_size, HIDDEN1)
    w2, b2 = linear(k2, HIDDEN1, HIDDEN2)
    w3, b3 = linear(k3, HIDDEN2, action_size)
    return {"w1": w1, "b1": b1, "w2": w2, "b2": b2, "w3": w3, "b3": b3}


if __name__ == "__main__":
    state_size = 8
    action_size = 4

    key = jax.random.PRNGKey(0)
    kparams, kx_small, kx_big = jax.random.split(key, 3)
    params = init_params(kparams, state_size, action_size)
    prepped = prepare_params(params)   # one-time cast/pad, outside the per-call forward

    # Small batch (typical RL act() shape): single partial tile, masked writeback.
    x_small = jax.random.normal(kx_small, (2, state_size), dtype=jnp.float32)
    out_small = jax.block_until_ready(
        qnetwork_forward(x_small, prepped, action_size=action_size))
    assert out_small.shape == (2, action_size)

    # Larger batch: single grid step on v5e/v6e, 2 tiles on v7x.
    x_big = jax.random.normal(kx_big, (512, state_size), dtype=jnp.float32)
    out_big = jax.block_until_ready(
        qnetwork_forward(x_big, prepped, action_size=action_size))
    assert out_big.shape == (512, action_size)

    # Explicitly exercise the 2-tile (v7x-style) batch split on any chip.
    out_big2 = jax.block_until_ready(
        qnetwork_forward(x_big, prepped, action_size=action_size, num_batch_tiles=2))
    assert out_big2.shape == (512, action_size)

    for x, out in ((x_small, out_small), (x_big, out_big), (x_big, out_big2)):
        ref_bf16 = qnetwork_reference(x, params)
        ref_f32 = qnetwork_reference_f32(x, params)
        assert jnp.allclose(out, ref_bf16, atol=1e-3, rtol=1e-3), "mismatch vs bf16 reference"
        assert jnp.allclose(out, ref_f32, atol=5e-2, rtol=5e-2), "mismatch vs f32 reference"

    print("KERNEL_OK")
</pallas_src>

<mosaic_0001>
module attributes {stable_mosaic.version = 11 : i64} {
  func.func @_qnetwork_kernel(%arg0: i32, %arg1: memref<8x8xf32, #tpu.memory_space<vmem>>, %arg2: memref<8x128xbf16, #tpu.memory_space<vmem>>, %arg3: memref<1x128xf32, #tpu.memory_space<vmem>>, %arg4: memref<128x128xbf16, #tpu.memory_space<vmem>>, %arg5: memref<1x128xf32, #tpu.memory_space<vmem>>, %arg6: memref<128x128xbf16, #tpu.memory_space<vmem>>, %arg7: memref<1x128xf32, #tpu.memory_space<vmem>>, %arg8: memref<8x128xf32, #tpu.memory_space<vmem>>) attributes {dimension_semantics = [#tpu.dimension_semantics<parallel>], iteration_bounds = array<i64: 1>, scalar_prefetch = 0 : i64, scratch_operands = 0 : i64, tpu.core_type = #tpu.core_type<tc>, window_params = [{transform_indices = @transform_0, window_bounds = array<i64: 8, 8>}, {pipeline_mode = #tpu.pipeline_mode<synchronous>, transform_indices = @transform_1, window_bounds = array<i64: 8, 128>}, {pipeline_mode = #tpu.pipeline_mode<synchronous>, transform_indices = @transform_2, window_bounds = array<i64: 1, 128>}, {pipeline_mode = #tpu.pipeline_mode<synchronous>, transform_indices = @transform_3, window_bounds = array<i64: 128, 128>}, {pipeline_mode = #tpu.pipeline_mode<synchronous>, transform_indices = @transform_4, window_bounds = array<i64: 1, 128>}, {pipeline_mode = #tpu.pipeline_mode<synchronous>, transform_indices = @transform_5, window_bounds = array<i64: 128, 128>}, {pipeline_mode = #tpu.pipeline_mode<synchronous>, transform_indices = @transform_6, window_bounds = array<i64: 1, 128>}, {transform_indices = @transform_7, window_bounds = array<i64: 8, 128>}]} {
    %c0 = arith.constant 0 : index
    %c0_0 = arith.constant 0 : index
    %0 = vector.load %arg1[%c0, %c0_0] : memref<8x8xf32, #tpu.memory_space<vmem>>, vector<8x8xf32>
    %1 = arith.truncf %0 : vector<8x8xf32> to vector<8x8xbf16>
    %c0_1 = arith.constant 0 : index
    %c0_2 = arith.constant 0 : index
    %2 = vector.load %arg2[%c0_1, %c0_2] : memref<8x128xbf16, #tpu.memory_space<vmem>>, vector<8x128xbf16>
    %cst = arith.constant dense<0.000000e+00> : vector<8x128xf32>
    %3 = tpu.matmul %1, %2, %cst {dimension_numbers = #tpu.dot_dimension_numbers<[1], [0], [0], [1], [0, 0, 1, 1], [], []>} : vector<8x8xbf16>, vector<8x128xbf16>, vector<8x128xf32> -> vector<8x128xf32>
    %c0_3 = arith.constant 0 : index
    %c0_4 = arith.constant 0 : index
    %4 = vector.load %arg3[%c0_3, %c0_4] : memref<1x128xf32, #tpu.memory_space<vmem>>, vector<1x128xf32>
    %5 = vector.broadcast %4 : vector<1x128xf32> to vector<8x128xf32>
    %6 = arith.addf %3, %5 : vector<8x128xf32>
    %cst_5 = arith.constant 0.000000e+00 : f32
    %7 = vector.broadcast %cst_5 : f32 to vector<8x128xf32>
    %8 = arith.maximumf %6, %7 : vector<8x128xf32>
    %9 = arith.truncf %8 : vector<8x128xf32> to vector<8x128xbf16>
    %c0_6 = arith.constant 0 : index
    %c0_7 = arith.constant 0 : index
    %10 = vector.load %arg4[%c0_6, %c0_7] : memref<128x128xbf16, #tpu.memory_space<vmem>>, vector<128x128xbf16>
    %cst_8 = arith.constant dense<0.000000e+00> : vector<8x128xf32>
    %11 = tpu.matmul %9, %10, %cst_8 {dimension_numbers = #tpu.dot_dimension_numbers<[1], [0], [0], [1], [0, 0, 1, 1], [], []>} : vector<8x128xbf16>, vector<128x128xbf16>, vector<8x128xf32> -> vector<8x128xf32>
    %c0_9 = arith.constant 0 : index
    %c0_10 = arith.constant 0 : index
    %12 = vector.load %arg5[%c0_9, %c0_10] : memref<1x128xf32, #tpu.memory_space<vmem>>, vector<1x128xf32>
    %13 = vector.broadcast %12 : vector<1x128xf32> to vector<8x128xf32>
    %14 = arith.addf %11, %13 : vector<8x128xf32>
    %cst_11 = arith.constant 0.000000e+00 : f32
    %15 = vector.broadcast %cst_11 : f32 to vector<8x128xf32>
    %16 = arith.maximumf %14, %15 : vector<8x128xf32>
    %17 = arith.truncf %16 : vector<8x128xf32> to vector<8x128xbf16>
    %c0_12 = arith.constant 0 : index
    %c0_13 = arith.constant 0 : index
    %18 = vector.load %arg6[%c0_12, %c0_13] : memref<128x128xbf16, #tpu.memory_space<vmem>>, vector<128x128xbf16>
    %cst_14 = arith.constant dense<0.000000e+00> : vector<8x128xf32>
    %19 = tpu.matmul %17, %18, %cst_14 {dimension_numbers = #tpu.dot_dimension_numbers<[1], [0], [0], [1], [0, 0, 1, 1], [], []>} : vector<8x128xbf16>, vector<128x128xbf16>, vector<8x128xf32> -> vector<8x128xf32>
    %c0_15 = arith.constant 0 : index
    %c0_16 = arith.constant 0 : index
    %20 = vector.load %arg7[%c0_15, %c0_16] : memref<1x128xf32, #tpu.memory_space<vmem>>, vector<1x128xf32>
    %21 = vector.broadcast %20 : vector<1x128xf32> to vector<8x128xf32>
    %22 = arith.addf %19, %21 : vector<8x128xf32>
    %cst_17 = arith.constant 0.000000e+00 : f32
    %23 = vector.broadcast %cst_17 : f32 to vector<8x128xf32>
    %24 = arith.maximumf %22, %23 : vector<8x128xf32>
    %c0_18 = arith.constant 0 : index
    %c0_19 = arith.constant 0 : index
    %25 = vector.load %arg8[%c0_18, %c0_19] : memref<8x128xf32, #tpu.memory_space<vmem>>, vector<8x128xf32>
    tpu.vector_store %arg8[%c0_18, %c0_19], %24 {strides = array<i32>} : memref<8x128xf32, #tpu.memory_space<vmem>>, vector<8x128xf32>,
    return
  }
  func.func @transform_0(%arg0: i32) -> (i32, i32) {
    %c0_i32 = arith.constant 0 : i32
    %c0_i32_0 = arith.constant 0 : i32
    return %arg0, %c0_i32 : i32, i32
  }
  func.func @transform_1(%arg0: i32) -> (i32, i32) {
    %c0_i32 = arith.constant 0 : i32
    %c0_i32_0 = arith.constant 0 : i32
    %c0_i32_1 = arith.constant 0 : i32
    return %c0_i32, %c0_i32_0 : i32, i32
  }
  func.func @transform_2(%arg0: i32) -> (i32, i32) {
    %c0_i32 = arith.constant 0 : i32
    %c0_i32_0 = arith.constant 0 : i32
    %c0_i32_1 = arith.constant 0 : i32
    return %c0_i32, %c0_i32_0 : i32, i32
  }
  func.func @transform_3(%arg0: i32) -> (i32, i32) {
    %c0_i32 = arith.constant 0 : i32
    %c0_i32_0 = arith.constant 0 : i32
    %c0_i32_1 = arith.constant 0 : i32
    return %c0_i32, %c0_i32_0 : i32, i32
  }
  func.func @transform_4(%arg0: i32) -> (i32, i32) {
    %c0_i32 = arith.constant 0 : i32
    %c0_i32_0 = arith.constant 0 : i32
    %c0_i32_1 = arith.constant 0 : i32
    return %c0_i32, %c0_i32_0 : i32, i32
  }
  func.func @transform_5(%arg0: i32) -> (i32, i32) {
    %c0_i32 = arith.constant 0 : i32
    %c0_i32_0 = arith.constant 0 : i32
    %c0_i32_1 = arith.constant 0 : i32
    return %c0_i32, %c0_i32_0 : i32, i32
  }
  func.func @transform_6(%arg0: i32) -> (i32, i32) {
    %c0_i32 = arith.constant 0 : i32
    %c0_i32_0 = arith.constant 0 : i32
    %c0_i32_1 = arith.constant 0 : i32
    return %c0_i32, %c0_i32_0 : i32, i32
  }
  func.func @transform_7(%arg0: i32) -> (i32, i32) {
    %c0_i32 = arith.constant 0 : i32
    %c0_i32_0 = arith.constant 0 : i32
    return %arg0, %c0_i32 : i32, i32
  }
}

</mosaic_0001>

<bundles_post_ra>
// kernel: qnetwork_forward.1
= control target key start
LH: loop header
LB: loop body
LE: loop exit
PB: predicated region body
PF: predicated region fallthrough
CT: control target
= control target key end

     0   :  { %12 = vsyncpa [#allocation3], 0  ;;  %s724_s0 = inlined_call_operand.hbm [shape: f32[2,8], index: 0, kind: input, shape index: {}]   ;;  %s725_s1 = inlined_call_operand.vmem [shape: bf16[8,128], index: 1, kind: input, shape index: {}]   ;;  %s726_s2 = inlined_call_operand.vmem [shape: f32[1,128], index: 2, kind: input, shape index: {}]   ;;  %s727_s3 = inlined_call_operand.hbm [shape: bf16[128,128], index: 3, kind: input, shape index: {}]   ;;  %s728_s4 = inlined_call_operand.vmem [shape: f32[1,128], index: 4, kind: input, shape index: {}]   ;;  %s729_s5 = inlined_call_operand.hbm [shape: bf16[128,128], index: 5, kind: input, shape index: {}]   ;;  %s730_s6 = inlined_call_operand.vmem [shape: f32[1,128], index: 6, kind: input, shape index: {}]   ;;  %s731_s7 = inlined_call_operand.hbm [shape: f32[2,128], index: 7, kind: output, shape index: {}]  }
   0x1   :  { %13 = vsyncpa [#allocation6], 0 }
   0x2   :  { %14 = vsyncpa [#allocation4], 0 }
   0x3   :  { %19 = vsyncadd [#allocation3], 96  ;;  %s579_s24 = smov [#allocation5]   ;;  %s485_s28 = scalar_lea.hbm %s727_s3, 1024 }
   0x4   :  { %s36_s25 = sshll.u32 %s579_s24, 4  ;;  %p486_p0 = scmp.ne.s32.totalorder %s727_s3, %s485_s28  ;;  %s37_s25 = int_to_ptr.vmem [resolvable:$true] %s36_s25 }
   0x5   :  { %p489_p1 = scmp.lt.u32.totalorder %s485_s28, %s727_s3 }
   0x7   :  { %p491_p2 = pnand %p489_p1, %p486_p0 }
   0x9   :  { %494 = shalt.err (!%p491_p2)
}
   0xa   :  { %s495_s10 = scalar_lea.vmem %s37_s25, 1024  ;;  %p500_p4 = scmp.lt.s32.totalorder %s37_s25, %s37_s25 }
   0xb   :  { %p496_p3 = scmp.ne.s32.totalorder %s37_s25, %s495_s10  ;;  %p501_p5 = scmp.lt.s32.totalorder %s495_s10, %s495_s10 }
   0xd   :  { %p502_p6 = por %p501_p5, %p500_p4 }
   0xf   :  { %p503_p7 = pnand %p502_p6, %p496_p3 }
  0x11   :  { %506 = shalt.err (!%p503_p7)
}
  0x12   :  { %s580_s11 = smov 64   ;;  %s581_s12 = smov 4  }
  0x13   :  { %42 = dma.hbm_to_vmem [thread:$0]  %s727_s3, 1024, %s37_s25, [#allocation6], %s580_s11, %s580_s11, %s581_s12  }
  0x14   :  { %s582_s15 = smov [#allocation2]   ;;  %s507_s19 = scalar_lea.hbm %s724_s0, 32 }
  0x15   :  { %s20_s16 = sshll.u32 %s582_s15, 4  ;;  %p508_p8 = scmp.ne.s32.totalorder %s724_s0, %s507_s19  ;;  %s21_s16 = int_to_ptr.vmem [resolvable:$true] %s20_s16 }
  0x16   :  { %p511_p9 = scmp.lt.u32.totalorder %s507_s19, %s724_s0 }
  0x18   :  { %p513_p10 = pnand %p511_p9, %p508_p8 }
  0x1a   :  { %516 = shalt.err (!%p513_p10)
}
  0x1b   :  { %s517_s24 = scalar_lea.vmem %s21_s16, 32  ;;  %s521_s3 = scalar_lea.vmem %s21_s16, 128 }
  0x1c   :  { %p518_p11 = scmp.ne.s32.totalorder %s21_s16, %s517_s24  ;;  %p522_p12 = scmp.lt.s32.totalorder %s21_s16, %s21_s16 }
  0x1d   :  { %p523_p13 = scmp.lt.s32.totalorder %s521_s3, %s517_s24 }
  0x1f   :  { %p524_p0 = por %p523_p13, %p522_p12 }
  0x21   :  { %p525_p1 = pnand %p524_p0, %p518_p11 }
  0x23   :  { %528 = shalt.err (!%p525_p1)
}
  0x24   :  { %s583_s25 = smov 32   ;;  %s584_s26 = smov 2  }
  0x25   :  { %26 = dma.hbm_to_vmem [thread:$0]  %s724_s0, 32, %s21_s16, [#allocation3], %s583_s25, %s583_s25, %s584_s26  }
  0x26   :  { %s585_s29 = smov [#allocation7]   ;;  %s529_s10 = scalar_lea.hbm %s729_s5, 1024 }
  0x27   :  { %s50_s30 = sshll.u32 %s585_s29, 4  ;;  %p530_p2 = scmp.ne.s32.totalorder %s729_s5, %s529_s10  ;;  %s51_s30 = int_to_ptr.vmem [resolvable:$true] %s50_s30 }
  0x28   :  { %p533_p3 = scmp.lt.u32.totalorder %s529_s10, %s729_s5 }
  0x2a   :  { %p535_p4 = pnand %p533_p3, %p530_p2 }
  0x2c   :  { %538 = shalt.err (!%p535_p4)
}
  0x2d   :  { %s539_s18 = scalar_lea.vmem %s51_s30, 1024  ;;  %p544_p6 = scmp.lt.s32.totalorder %s51_s30, %s51_s30 }
  0x2e   :  { %p540_p5 = scmp.ne.s32.totalorder %s51_s30, %s539_s18  ;;  %p545_p7 = scmp.lt.s32.totalorder %s539_s18, %s539_s18 }
  0x30   :  { %p546_p8 = por %p545_p7, %p544_p6 }
  0x32   :  { %p547_p9 = pnand %p546_p8, %p540_p5 }
  0x34   :  { %550 = shalt.err (!%p547_p9)
}
  0x35   :  { %56 = dma.hbm_to_vmem [thread:$0]  %s729_s5, 1024, %s51_s30, [#allocation6], %s580_s11, %s580_s11, %s581_s12  }
  0x36   :  { %573 = dma.done.wait [#allocation3], 128  }
  0x37   :  { %574 = vsyncadd [#allocation3], 4294967168 }
  0x38   :  { %575 = dma.done.wait [#allocation6], 2048  }
  0x39   :  { %576 = vsyncadd [#allocation6], 4294965248  ;;  %v586_v0 = vmov 0.0   ;;  %vm587_vm0 = vmmov 0   ;;  %vm83_vm1 = vcmask 1043456   ;;  %v69_v2 = vld [vmem:[#allocation2] sm:$0xff] }
  0x3a   :  { %413 = vmatprep.subr.bf16.mxu0 %v586_v0  ;;  %415 = vmatprep.mubr.msk.bf16.mxu0 %vm587_vm0, %v586_v0  ;;  %v71_v1 = vld [vmem:[%s725_s1] sm:$0xf]  ;;  %v70_v4 = vpack.c.bf16 %v69_v2, %v69_v2  ;;  %v469_v5 = vld [vmem:[#allocation5] sm:$0xff]   ;;  %vm79_vm2 = vcmask 64512   ;;  %v470_v6 = vld [vmem:[#allocation5 + $0x8] sm:$0xff]  }
  0x3b   :  { %419 = vmatprep.subr.bf16.mxu1 %v586_v0  ;;  %435 = vmatprep.mubr.msk.bf16.mxu1 %vm587_vm0, %v586_v0  ;;  %v85_v3 = vsel %vm83_vm1, %v71_v1, 0  ;;  %v471_v7 = vld [vmem:[#allocation5 + $0x10] sm:$0xff]   ;;  %v472_v8 = vld [vmem:[#allocation5 + $0x18] sm:$0xff]   ;;  %v473_v9 = vld [vmem:[#allocation5 + $0x20] sm:$0xff]  }
  0x3c   :  { %414 = vmatpush3.bf16.msra.mxu0 %v85_v3  ;;  %420 = vmatpush3.bf16.msra.mxu1 %v469_v5  ;;  %v474_v10 = vld [vmem:[#allocation5 + $0x28] sm:$0xff]   ;;  %v475_v11 = vld [vmem:[#allocation5 + $0x30] sm:$0xff]   ;;  %v476_v12 = vld [vmem:[#allocation5 + $0x38] sm:$0xff]  }
  0x3d   :  { %439 = vmatprep.subr.bf16.mxu0 %v586_v0  ;;  %421 = vmatprep.subr.bf16.mxu1 %v586_v0  ;;  %v477_v13 = vld [vmem:[#allocation7] sm:$0xff]   ;;  %v478_v14 = vld [vmem:[#allocation7 + $0x8] sm:$0xff]   ;;  %v479_v15 = vld [vmem:[#allocation7 + $0x10] sm:$0xff]  }
  0x3e   :  { %v480_v16 = vld [vmem:[#allocation7 + $0x18] sm:$0xff]   ;;  %v481_v17 = vld [vmem:[#allocation7 + $0x20] sm:$0xff]   ;;  %v482_v18 = vld [vmem:[#allocation7 + $0x28] sm:$0xff]  }
  0x3f   :  { %416 = vmatmul.mubr.msk.bf16.vlgmr.msra.gmra.mrb[0].mxu0 %vm79_vm2, %v70_v4  ;;  %v373_v19 = vld [vmem:[%s726_s2] ss:$0 sm:$0xff]  ;;  %v484_v28 = vld [vmem:[#allocation7 + $0x38] sm:$0xff]  }
  0x40   :  { %455 = vmatprep.mubr.msk.bf16.mxu0 %vm587_vm0, %v586_v0  ;;  %422 = vmatpush3.bf16.msra.mxu1 %v470_v6  ;;  %v483_v27 = vld [vmem:[#allocation7 + $0x30] sm:$0xff]  }
  0x41   :  { %423 = vmatprep.subr.bf16.mxu1 %v586_v0  ;;  %440 = vmatpush3.bf16.msra.mxu0 %v477_v13  ;;  %v375_v29 = vld [vmem:[%s728_s4] ss:$0 sm:$0xff] }
  0x42   :  { %441 = vmatprep.subr.bf16.mxu0 %v586_v0  ;;  %v384_v37 = vld [vmem:[%s730_s6] ss:$0 sm:$0xff] }
  0x44   :  { %424 = vmatpush3.bf16.msra.mxu1 %v471_v7 }
  0x45   :  { %425 = vmatprep.subr.bf16.mxu1 %v586_v0  ;;  %442 = vmatpush3.bf16.msra.mxu0 %v478_v14 }
  0x46   :  { %443 = vmatprep.subr.bf16.mxu0 %v586_v0 }
  0x48   :  { %426 = vmatpush3.bf16.msra.mxu1 %v472_v8 }
  0x49   :  { %427 = vmatprep.subr.bf16.mxu1 %v586_v0  ;;  %444 = vmatpush3.bf16.msra.mxu0 %v479_v15 }
  0x4a   :  { %445 = vmatprep.subr.bf16.mxu0 %v586_v0 }
  0x4c   :  { %428 = vmatpush3.bf16.msra.mxu1 %v473_v9 }
  0x4d   :  { %429 = vmatprep.subr.bf16.mxu1 %v586_v0  ;;  %446 = vmatpush3.bf16.msra.mxu0 %v480_v16 }
  0x4e   :  { %447 = vmatprep.subr.bf16.mxu0 %v586_v0 }
  0x50   :  { %430 = vmatpush3.bf16.msra.mxu1 %v474_v10 }
  0x51   :  { %431 = vmatprep.subr.bf16.mxu1 %v586_v0  ;;  %448 = vmatpush3.bf16.msra.mxu0 %v481_v17 }
  0x52   :  { %449 = vmatprep.subr.bf16.mxu0 %v586_v0 }
  0x54   :  { %432 = vmatpush3.bf16.msra.mxu1 %v475_v11 }
  0x55   :  { %433 = vmatprep.subr.bf16.mxu1 %v586_v0  ;;  %450 = vmatpush3.bf16.msra.mxu0 %v482_v18 }
  0x56   :  { %451 = vmatprep.subr.bf16.mxu0 %v586_v0 }
  0x58   :  { %434 = vmatpush3.bf16.msra.mxu1 %v476_v12 }
  0x59   :  { %452 = vmatpush3.bf16.msra.mxu0 %v483_v27 }
  0x5a   :  { %453 = vmatprep.subr.bf16.mxu0 %v586_v0 }
  0x5d   :  { %454 = vmatpush3.bf16.msra.mxu0 %v484_v28 }
 0x112   :  { %v121_v20 = vpop.f32.mrb[0].mxu0 }
 0x113   :  { %v122_v21 = vadd.f32 %v373_v19, %v121_v20  ;;  %v417_v22 = vpop.f32.mrb[1].mxu0 }
 0x114   :  { %v124_v23 = vpop.f32.mrb[2].mxu0 }
 0x115   :  { %v127_v24 = vmax.f32 %v122_v21, 0.0  ;;  %v418_v25 = vpop.f32.mrb[3].mxu0 }
 0x117   :  { %v128_v26 = vpack.c.bf16 %v127_v24, %v127_v24 }
 0x119   :  { %436 = vmatmul.mubr.bf16.vlgmr.msra.gmra.mrb[0].mxu1 %v128_v26 }
 0x1ec   :  { %v234_v30 = vpop.f32.mrb[0].mxu1 }
 0x1ed   :  { %v235_v31 = vadd.f32 %v375_v29, %v234_v30  ;;  %v437_v32 = vpop.f32.mrb[1].mxu1 }
 0x1ee   :  { %v237_v33 = vpop.f32.mrb[2].mxu1 }
 0x1ef   :  { %v240_v34 = vmax.f32 %v235_v31, 0.0  ;;  %v438_v35 = vpop.f32.mrb[3].mxu1 }
 0x1f1   :  { %v241_v36 = vpack.c.bf16 %v240_v34, %v240_v34 }
 0x1f3   :  { %456 = vmatmul.mubr.bf16.vlgmr.msra.gmra.mrb[4].mxu0 %v241_v36 }
 0x2c6   :  { %v347_v38 = vpop.f32.mrb[4].mxu0 }
 0x2c7   :  { %v348_v39 = vadd.f32 %v384_v37, %v347_v38  ;;  %v457_v40 = vpop.f32.mrb[5].mxu0 }
 0x2c8   :  { %v350_v41 = vpop.f32.mrb[6].mxu0 }
 0x2c9   :  { %v353_v42 = vmax.f32 %v348_v39, 0.0  ;;  %v458_v43 = vpop.f32.mrb[7].mxu0 }
 0x2cb   :  { %354 = vst [vmem:[#allocation8] sm:$0xff] %v353_v42 }
 0x2cc   :  { %359 = vsyncadd [#allocation4], 96  ;;  %s588_s4 = smov [#allocation8]  }
 0x2cd   :  { %s360_s22 = sshll.u32 %s588_s4, 4  ;;  %s361_s22 = int_to_ptr.vmem [resolvable:$true] %s360_s22 }
 0x2ce   :  { %s551_s23 = scalar_lea.vmem %s361_s22, 32  ;;  %s555_s24 = scalar_lea.vmem %s361_s22, 128 }
 0x2cf   :  { %p552_p10 = scmp.ne.s32.totalorder %s361_s22, %s551_s23  ;;  %p556_p11 = scmp.lt.s32.totalorder %s361_s22, %s361_s22 }
 0x2d0   :  { %p557_p12 = scmp.lt.s32.totalorder %s555_s24, %s551_s23 }
 0x2d2   :  { %p558_p13 = por %p557_p12, %p556_p11 }
 0x2d4   :  { %p559_p0 = pnand %p558_p13, %p552_p10 }
 0x2d6   :  { %562 = shalt.err (!%p559_p0)
}
 0x2d7   :  { %s563_s27 = scalar_lea.hbm %s731_s7, 32 }
 0x2d8   :  { %p564_p1 = scmp.ne.s32.totalorder %s731_s7, %s563_s27  ;;  %p567_p2 = scmp.lt.u32.totalorder %s563_s27, %s731_s7 }
 0x2da   :  { %p569_p3 = pnand %p567_p2, %p564_p1 }
 0x2dc   :  { %572 = shalt.err (!%p569_p3)
}
 0x2dd   :  { %366 = dma.vmem_to_hbm [thread:$0]  %s361_s22, 32, %s731_s7, [#allocation4], %s583_s25, %s583_s25, %s584_s26  }
 0x2de   :  { %577 = dma.done.wait [#allocation4], 128  }
 0x2df   :  { %578 = vsyncadd [#allocation4], 4294967168 }
 0x2e0   :  { %370 = vsyncpa [#allocation3], 1 }
 0x2e1   :  { %371 = vsyncpa [#allocation6], 1 }
 0x2e2   :  { %372 = vsyncpa [#allocation4], 1 }

</bundles_post_ra>
